<compile_context>
chip_gen: v5e
topology: v5e:2x2
jax: 0.10.0
libtpu: 0.0.40
codegen_flags: <defaults>
</compile_context>

<pallas_src>
import functools

import numpy as np
import jax
import jax.numpy as jnp
from jax import lax
from jax.experimental import pallas as pl
from jax.experimental.pallas import tpu as pltpu
from jax.scipy.special import gammaln

# bandwidth grid of the reference heuristic:
# torch.cat((torch.logspace(-5, -1, 15), torch.linspace(0.2, 1, 5)))
_BANDWIDTHS = tuple(
    float(b)
    for b in np.concatenate(
        [np.logspace(-5.0, -1.0, 15), np.linspace(0.2, 1.0, 5)]
    ).astype(np.float32)
)

_LANE = 128
_BIG = 1e30  # finite stand-in for +inf column padding (avoids -inf - inf = NaN after hoist)


def _round_up(x, m):
    return (x + m - 1) // m * m


def _vmem_limit_bytes():
    """Per-chip VMEM budget: ~75% of physical (96 MiB on v5e/v6e, 48 MiB on v7x)."""
    try:
        cap = int(pltpu.get_tpu_info().vmem_capacity_bytes)
    except Exception:
        cap = 64 << 20
    return int(min(cap * 3 // 4, 100 << 20))


def _pick_tm(n_pad, bytes_per_row, resident_bytes):
    """Largest row tile (multiple of 8 dividing n_pad) whose live slabs fit the budget."""
    avail = max(_vmem_limit_bytes() - resident_bytes - (4 << 20), 2 << 20)
    max_tm = max(avail // max(bytes_per_row, 1), 8)
    for cand in (512, 256, 128, 64, 32, 16, 8):
        if n_pad % cand == 0 and cand <= max_tm:
            return cand
    return 8


def _spec(shape, index_map, *, buffers=None):
    """BlockSpec; buffers=1 single-buffers grid-invariant operands (fallback: default)."""
    if buffers is not None:
        try:
            return pl.BlockSpec(shape, index_map, pipeline_mode=pl.Buffered(buffers))
        except (TypeError, AttributeError):
            pass
    return pl.BlockSpec(shape, index_map)


def _pad_rows_cols(x, n_pad, k_pad, row_fill=0.0):
    """Pad (n, k) -> (n_pad, k_pad); padded rows get row_fill in real lanes, padded lanes 0."""
    n, k = x.shape
    x = x.astype(jnp.float32)
    if n_pad > n:
        x = jnp.concatenate([x, jnp.full((n_pad - n, k), row_fill, jnp.float32)], axis=0)
    if k_pad > k:
        x = jnp.pad(x, ((0, 0), (0, k_pad - k)))
    return x


# ---------------------------------------------------------------------------
# p_bar = sum_m weights_l[n, m] * p_preds[n, m, :]
# ---------------------------------------------------------------------------
def _pbar_kernel(p_ref, w_ref, sel_ref, out_ref):
    # p_bar[n, c] = sum_m w[n, m] * p[n, m, c], computed as (w ⊙ p_flat) @ S with a static
    # 0/1 class-selection matrix -> one lane-dense (tm, K_pad) MXU result.
    out_ref[...] = jnp.dot(w_ref[...] * p_ref[...], sel_ref[...],
                           preferred_element_type=jnp.float32)


def calculate_pbar(weights_l, p_preds):
    n, m, k = p_preds.shape
    km = k * m
    km_pad = _round_up(km, _LANE)
    k_pad = _round_up(k, _LANE)
    n_pad = _round_up(n, _LANE)
    # TODO(synk): for large K (>~32 classes) replace the selection-matrix matmul with a
    # direct M-reduction kernel (sel grows as (K*M, K) and the matmul wastes MACs).
    resident = km_pad * k_pad * 4                       # sel (single-buffered)
    per_row = (6 * km_pad + 2 * k_pad) * 4              # 2 dbl-buffered inputs + temps + out
    tm = _pick_tm(n_pad, per_row, resident)
    num_tiles = n_pad // tm

    # glue: class-major flatten  p2d[i, c*m + j] = p_preds[i, j, c]
    p2d = jnp.transpose(p_preds, (0, 2, 1)).reshape(n, km).astype(jnp.float32)
    w2d = jnp.tile(weights_l.astype(jnp.float32), (1, k))
    p2d = jnp.pad(p2d, ((0, n_pad - n), (0, km_pad - km)))
    w2d = jnp.pad(w2d, ((0, n_pad - n), (0, km_pad - km)))

    sel = np.zeros((km_pad, k_pad), np.float32)         # static 0/1 selection matrix
    for c in range(k):
        sel[c * m:(c + 1) * m, c] = 1.0
    sel = jnp.asarray(sel)

    out = pl.pallas_call(
        _pbar_kernel,
        grid=(num_tiles,),
        out_shape=jax.ShapeDtypeStruct((n_pad, k_pad), jnp.float32),
        in_specs=[pl.BlockSpec((tm, km_pad), lambda i: (i, 0)),
                  pl.BlockSpec((tm, km_pad), lambda i: (i, 0)),
                  _spec((km_pad, k_pad), lambda i: (0, 0), buffers=1)],
        out_specs=pl.BlockSpec((tm, k_pad), lambda i: (i, 0)),
        compiler_params=pltpu.CompilerParams(
            dimension_semantics=("parallel",),
            vmem_limit_bytes=_vmem_limit_bytes()),
    )(p2d, w2d, sel)
    return out[:n, :k]


# ---------------------------------------------------------------------------
# Bandwidth selection: leave-one-out log likelihood per candidate bandwidth.
# One shared Gram matmul + one diagonal mask per row tile; 20 cheap VPU rescales + row LSEs.
# ---------------------------------------------------------------------------
def _bw_loglik_kernel(logz_ref, zfull_ref, logbetas_ref, out_ref, *, n_actual, bandwidths):
    tm = logz_ref.shape[0]
    n_pad = zfull_ref.shape[0]
    n_bw = len(bandwidths)
    row0 = pl.multiple_of(pl.program_id(0) * tm, tm)

    # Shared Gram: G[i, j] = sum_k log(z[row0+i, k]) * z[j, k]; per bandwidth the Dirichlet
    # log-kernel is just G / b - logBeta_b[j]  (alphas_j - 1 = z_j / b).
    gram = lax.dot_general(logz_ref[...], zfull_ref[...],
                           (((1,), (1,)), ((), ())),
                           preferred_element_type=jnp.float32)              # (tm, n_pad)

    # leave-one-out: exclude the diagonal ONCE (hoisted out of the 20-bandwidth loop)
    col_ids = lax.broadcasted_iota(jnp.int32, (tm, n_pad), 1)
    row_ids = lax.broadcasted_iota(jnp.int32, (tm, n_pad), 0) + row0
    gram = jnp.where(col_ids == row_ids, -jnp.inf, gram)
    row_valid = (lax.broadcasted_iota(jnp.int32, (tm, 1), 0) + row0) < n_actual

    cols = []
    for b_idx, b in enumerate(bandwidths):                                  # static unroll
        lb = logbetas_ref[pl.ds(b_idx, 1), :]                               # (1, n_pad)
        log_kern = gram * jnp.float32(1.0 / b) - lb
        row_max = jnp.max(log_kern, axis=1, keepdims=True)
        lse = jnp.log(jnp.sum(jnp.exp(log_kern - row_max), axis=1, keepdims=True)) + row_max
        log_fhat = lse - jnp.float32(np.log((n_actual - 1) * b))            # (tm, 1)
        log_fhat = jnp.where(row_valid, log_fhat, 0.0)                      # drop pad rows
        cols.append(jnp.sum(log_fhat, axis=0, keepdims=True))               # (1, 1)
    # lane-dense (1, 128) store: zero-fill beyond the n_bw real candidates
    cols.append(jnp.zeros((1, out_ref.shape[-1] - n_bw), jnp.float32))
    out_ref[0] = jnp.concatenate(cols, axis=1)


def get_bandwidth(p_bar, y=None):
    # NOTE: the reference LOO-MLE heuristic never uses y (it is passed but ignored).
    n, k = p_bar.shape
    k_pad = _round_up(k, _LANE)
    n_pad = _round_up(n, _LANE)
    n_bw = len(_BANDWIDTHS)
    n_bw_pad = _LANE
    bws = jnp.asarray(_BANDWIDTHS, jnp.float32)

    # clamp away from exact zero: only affects degenerate inputs, keeps log finite
    p_bar = jnp.maximum(p_bar.astype(jnp.float32), jnp.finfo(jnp.float32).tiny)
    zfull = _pad_rows_cols(p_bar, n_pad, k_pad, row_fill=1.0 / k)
    logz = _pad_rows_cols(jnp.log(p_bar), n_pad, k_pad, row_fill=0.0)

    # glue: log Beta normalizer needs lgamma (no Mosaic lowering) — only O(n_bw*N*K).
    alphas = p_bar[None, :, :] / bws[:, None, None] + 1.0                   # (n_bw, N, K)
    log_betas = jnp.sum(gammaln(alphas), axis=-1) - gammaln(jnp.sum(alphas, axis=-1))
    log_betas = jnp.pad(log_betas.astype(jnp.float32), ((0, 0), (0, n_pad - n)),
                        constant_values=_BIG)      # big finite => padded keys contribute 0

    resident = (n_pad * k_pad + n_bw * n_pad) * 4          # zfull + log-Beta (1-buffered)
    per_row = (4 * n_pad + 2 * k_pad) * 4                  # gram/log_kern/exp slabs + logz tiles
    tm = _pick_tm(n_pad, per_row, resident)
    num_tiles = n_pad // tm
    # TODO(synk): for very large N, add a second 'arbitrary' key axis with online-LSE
    # accumulators instead of keeping zfull/log_betas fully resident.

    kern = functools.partial(_bw_loglik_kernel, n_actual=n, bandwidths=_BANDWIDTHS)
    # TODO(synk): n_actual / bandwidths are baked in -> each distinct N recompiles.
    partial_sums = pl.pallas_call(
        kern,
        grid=(num_tiles,),
        out_shape=jax.ShapeDtypeStruct((num_tiles, 1, n_bw_pad), jnp.float32),
        in_specs=[pl.BlockSpec((tm, k_pad), lambda i: (i, 0)),
                  _spec((n_pad, k_pad), lambda i: (0, 0), buffers=1),
                  _spec((n_bw, n_pad), lambda i: (0, 0), buffers=1)],
        out_specs=pl.BlockSpec((1, 1, n_bw_pad), lambda i: (i, 0, 0)),
        compiler_params=pltpu.CompilerParams(
            dimension_semantics=("parallel",),
            vmem_limit_bytes=_vmem_limit_bytes()),
    )(logz, zfull, log_betas)
    liks = jnp.sum(partial_sums, axis=0).reshape(-1)[:n_bw]                 # (n_bw,)

    # Mirror torch selection loop (max_l init 0, strict '>'): first-occurrence argmax,
    # gated on the max being > 0, stays on device (no host round trip).
    best = jnp.max(liks)
    # TODO(synk): torch-parity footgun preserved — if every log-likelihood <= 0 this yields
    # -1.0, which then produces NaNs downstream in get_ece_kde.
    return jnp.where(best > 0.0, bws[jnp.argmax(liks)], jnp.float32(-1.0))


# ---------------------------------------------------------------------------
# canonical Lp ECE-KDE ratio estimator (get_ratio_canonical)
# ---------------------------------------------------------------------------
def _ece_kde_kernel(logz_ref, zfull_ref, yoh_ref, logbeta_ref, out_ref,
                    *, n_actual, p_order, den_col):
    tm = logz_ref.shape[0]
    n_pad = zfull_ref.shape[0]
    row0 = pl.multiple_of(pl.program_id(0) * tm, tm)

    # log rows are pre-scaled by 1/bw in the wrapper, so this single matmul is the full
    # Dirichlet log-numerator (no in-kernel scalar / divide needed).
    log_num = lax.dot_general(logz_ref[...], zfull_ref[...],
                              (((1,), (1,)), ((), ())),
                              preferred_element_type=jnp.float32)           # (tm, n_pad)
    col_ids = lax.broadcasted_iota(jnp.int32, (tm, n_pad), 1)
    row_ids = lax.broadcasted_iota(jnp.int32, (tm, n_pad), 0) + row0
    log_kern = jnp.where(col_ids == row_ids, -jnp.inf, log_num - logbeta_ref[...])

    # Row-max shift: the kern_y/den ratio is shift-invariant, exp no longer overflows.
    row_max = jnp.max(log_kern, axis=1, keepdims=True)
    kern = jnp.exp(log_kern - row_max)                                      # (tm, n_pad)
    # TODO(synk): on v6e/v7x kern could be bf16 (f32 accumulation) to halve this slab.

    # one-hot carries an all-ones column at den_col, so the row-sum denominator rides the
    # same MXU matmul — no separate full-width XLU reduction.
    kern_y = jnp.dot(kern, yoh_ref[...], preferred_element_type=jnp.float32)  # (tm, k_pad)
    den = jnp.maximum(kern_y[:, den_col:den_col + 1], 1e-10)               # (tm, 1)
    ratio = kern_y / den

    # query-row probabilities sliced from the resident zfull (no duplicate row-tile input);
    # its den_col lane is 1.0 so that lane's diff cancels exactly.
    z_rows = zfull_ref[pl.ds(row0, tm), :]
    diff = ratio - z_rows                                                   # pad lanes -> 0
    if p_order == 1:
        pr = jnp.abs(diff)
    elif p_order == 2:
        pr = diff * diff
    else:
        pr = jnp.abs(diff) ** p_order                                       # static int power
    per_row = jnp.sum(pr, axis=1, keepdims=True)                            # (tm, 1)
    row_valid = (lax.broadcasted_iota(jnp.int32, (tm, 1), 0) + row0) < n_actual
    per_row = jnp.where(row_valid, per_row, 0.0)
    total = jnp.sum(per_row, axis=0, keepdims=True)                         # (1, 1)
    out_ref[0] = jnp.concatenate(
        [total, jnp.zeros((1, out_ref.shape[-1] - 1), jnp.float32)], axis=1)


def get_ece_kde(p_bar, y, bw, p):
    n, k = p_bar.shape
    k_pad = _round_up(k + 1, _LANE)      # +1 spare lane for the all-ones denominator column
    den_col = k
    n_pad = _round_up(n, _LANE)

    bw = jnp.asarray(bw, jnp.float32)
    p_bar = jnp.maximum(p_bar.astype(jnp.float32), jnp.finfo(jnp.float32).tiny)

    zfull = _pad_rows_cols(p_bar, n_pad, k_pad, row_fill=1.0 / k)
    zfull = zfull.at[:, den_col].set(1.0)          # ones lane cancels exactly in the diff
    # fold 1/bw into the log rows -> no scalar operand in the kernel
    logz_scaled = _pad_rows_cols(jnp.log(p_bar) / bw, n_pad, k_pad, row_fill=0.0)

    # lane-dense one-hot (zeros in padded lanes/rows) + all-ones denominator column
    yoh = jnp.zeros((n_pad, k_pad), jnp.float32)
    yoh = yoh.at[:n, :k].set(jax.nn.one_hot(y, k, dtype=jnp.float32))
    yoh = yoh.at[:, den_col].set(1.0)

    # glue: log Beta normalizer (lgamma has no Mosaic lowering)
    alphas = p_bar / bw + 1.0
    log_beta = jnp.sum(gammaln(alphas), axis=1) - gammaln(jnp.sum(alphas, axis=1))  # (N,)
    log_beta = jnp.pad(log_beta.astype(jnp.float32), (0, n_pad - n),
                       constant_values=_BIG)[None, :]                        # (1, n_pad)

    resident = (2 * n_pad * k_pad + n_pad) * 4      # zfull + one-hot + log-Beta (1-buffered)
    per_row = (4 * n_pad + 4 * k_pad) * 4           # log_kern/kern slabs + logz tiles + kern_y
    tm = _pick_tm(n_pad, per_row, resident)
    num_tiles = n_pad // tm
    # TODO(synk): for very large N, tile the key axis too (online max/sum accumulators).

    kern = functools.partial(_ece_kde_kernel, n_actual=n, p_order=int(p), den_col=den_col)
    partial_sums = pl.pallas_call(
        kern,
        grid=(num_tiles,),
        out_shape=jax.ShapeDtypeStruct((num_tiles, 1, _LANE), jnp.float32),
        in_specs=[pl.BlockSpec((tm, k_pad), lambda i: (i, 0)),          # log(z)/bw row tile
                  _spec((n_pad, k_pad), lambda i: (0, 0), buffers=1),   # z (resident)
                  _spec((n_pad, k_pad), lambda i: (0, 0), buffers=1),   # one-hot (resident)
                  _spec((1, n_pad), lambda i: (0, 0), buffers=1)],      # log Beta (resident)
        out_specs=pl.BlockSpec((1, 1, _LANE), lambda i: (i, 0, 0)),
        compiler_params=pltpu.CompilerParams(
            dimension_semantics=("parallel",),
            vmem_limit_bytes=_vmem_limit_bytes()),
    )(logz_scaled, zfull, yoh, log_beta)
    return jnp.sum(partial_sums) / n


# ---------------------------------------------------------------------------
# LpLoss module equivalent
# ---------------------------------------------------------------------------
class LpLossPallas:
    """Pallas TPU equivalent of the torch LpLoss module (canonical mc_type)."""

    def __init__(self, p: int, bw=None, debug: bool = False):
        self.p = p
        self.bw = bw
        self.debug = debug

    def __call__(self, p_preds, weights_l, y):
        p_bar = calculate_pbar(weights_l, p_preds)
        y = y.astype(jnp.int32)
        bw = self.bw if self.bw is not None else get_bandwidth(p_bar, y)
        if self.debug:
            # debug-only: forces a device sync, so it is off by default
            assert not bool(jnp.any(jnp.isnan(p_bar))), "p_bar contains NaNs"
        return get_ece_kde(p_bar, y, bw, self.p)


if __name__ == "__main__":
    key = jax.random.PRNGKey(0)
    N, M, K = 64, 5, 4  # instances, ensemble members, classes
    k1, k2, k3 = jax.random.split(key, 3)
    p_preds = jax.nn.softmax(jax.random.normal(k1, (N, M, K), jnp.float32), axis=-1)
    weights_l = jax.nn.softmax(jax.random.normal(k2, (N, M), jnp.float32), axis=-1)
    y = jax.random.randint(k3, (N,), 0, K)

    loss = LpLossPallas(p=2, bw=None)        # bw=None -> on-device LOO-MLE heuristic
    lp_er = jax.block_until_ready(loss(p_preds, weights_l, y))

    loss_fixed = LpLossPallas(p=2, bw=0.5)   # also exercise the fixed-bandwidth path
    lp_er2 = jax.block_until_ready(loss_fixed(p_preds, weights_l, y))

    print("KERNEL_OK")
</pallas_src>

<mosaic_0001>
module attributes {stable_mosaic.version = 11 : i64} {
  func.func @_pbar_kernel(%arg0: i32, %arg1: memref<128x128xf32, #tpu.memory_space<vmem>>, %arg2: memref<128x128xf32, #tpu.memory_space<vmem>>, %arg3: memref<128x128xf32, #tpu.memory_space<vmem>>, %arg4: memref<128x128xf32, #tpu.memory_space<vmem>>) attributes {dimension_semantics = [#tpu.dimension_semantics<parallel>], iteration_bounds = array<i64: 1>, scalar_prefetch = 0 : i64, scratch_operands = 0 : i64, tpu.core_type = #tpu.core_type<tc>, window_params = [{transform_indices = @transform_0, window_bounds = array<i64: 128, 128>}, {transform_indices = @transform_1, window_bounds = array<i64: 128, 128>}, {pipeline_mode = #tpu.pipeline_mode<synchronous>, transform_indices = @transform_2, window_bounds = array<i64: 128, 128>}, {transform_indices = @transform_3, window_bounds = array<i64: 128, 128>}]} {
    %c0 = arith.constant 0 : index
    %c0_0 = arith.constant 0 : index
    %0 = vector.load %arg2[%c0, %c0_0] : memref<128x128xf32, #tpu.memory_space<vmem>>, vector<128x128xf32>
    %c0_1 = arith.constant 0 : index
    %c0_2 = arith.constant 0 : index
    %1 = vector.load %arg1[%c0_1, %c0_2] : memref<128x128xf32, #tpu.memory_space<vmem>>, vector<128x128xf32>
    %2 = arith.mulf %0, %1 : vector<128x128xf32>
    %c0_3 = arith.constant 0 : index
    %c0_4 = arith.constant 0 : index
    %3 = vector.load %arg3[%c0_3, %c0_4] : memref<128x128xf32, #tpu.memory_space<vmem>>, vector<128x128xf32>
    %cst = arith.constant dense<0.000000e+00> : vector<128x128xf32>
    %4 = tpu.matmul %2, %3, %cst {dimension_numbers = #tpu.dot_dimension_numbers<[1], [0], [0], [1], [0, 0, 1, 1], [], []>} : vector<128x128xf32>, vector<128x128xf32>, vector<128x128xf32> -> vector<128x128xf32>
    %c0_5 = arith.constant 0 : index
    %c0_6 = arith.constant 0 : index
    %5 = vector.load %arg4[%c0_5, %c0_6] : memref<128x128xf32, #tpu.memory_space<vmem>>, vector<128x128xf32>
    tpu.vector_store %arg4[%c0_5, %c0_6], %4 {strides = array<i32>} : memref<128x128xf32, #tpu.memory_space<vmem>>, vector<128x128xf32>,
    return
  }
  func.func @transform_0(%arg0: i32) -> (i32, i32) {
    %c0_i32 = arith.constant 0 : i32
    %c0_i32_0 = arith.constant 0 : i32
    return %arg0, %c0_i32 : i32, i32
  }
  func.func @transform_1(%arg0: i32) -> (i32, i32) {
    %c0_i32 = arith.constant 0 : i32
    %c0_i32_0 = arith.constant 0 : i32
    return %arg0, %c0_i32 : i32, i32
  }
  func.func @transform_2(%arg0: i32) -> (i32, i32) {
    %c0_i32 = arith.constant 0 : i32
    %c0_i32_0 = arith.constant 0 : i32
    %c0_i32_1 = arith.constant 0 : i32
    return %c0_i32, %c0_i32_0 : i32, i32
  }
  func.func @transform_3(%arg0: i32) -> (i32, i32) {
    %c0_i32 = arith.constant 0 : i32
    %c0_i32_0 = arith.constant 0 : i32
    return %arg0, %c0_i32 : i32, i32
  }
}

</mosaic_0001>

<bundles_post_ra>
// kernel: tpu_custom_call.1
= control target key start
LH: loop header
LB: loop body
LE: loop exit
PB: predicated region body
PF: predicated region fallthrough
CT: control target
= control target key end

     0   :  { %8 = vsyncpa [#allocation3], 0  ;;  %s433_s0 = inlined_call_operand.hbm [shape: f32[128,128], index: 0, kind: input, shape index: {}]   ;;  %s434_s1 = inlined_call_operand.hbm [shape: f32[128,128], index: 1, kind: input, shape index: {}]   ;;  %s435_s2 = inlined_call_operand.hbm [shape: f32[128,128], index: 2, kind: input, shape index: {}]   ;;  %s436_s3 = inlined_call_operand.hbm [shape: f32[128,128], index: 3, kind: output, shape index: {}]  }
   0x1   :  { %9 = vsyncpa [#allocation6], 0 }
   0x2   :  { %10 = vsyncpa [#allocation4], 0  ;;  %s28_s14 = sshll.u32 %s434_s1, 4  ;;  %s383_s15 = smov [#allocation5]   ;;  %s29_s14 = int_to_ptr.hbm [resolvable:$true] %s28_s14 }
   0x3   :  { %s30_s16 = sshll.u32 %s383_s15, 4  ;;  %s15_s19 = sshll.u32 %s433_s0, 4  ;;  %s31_s16 = int_to_ptr.vmem [resolvable:$true] %s30_s16  ;;  %s16_s19 = int_to_ptr.hbm [resolvable:$true] %s15_s19 }
   0x4   :  { %s384_s20 = smov 128   ;;  %s385_s21 = smov 8  }
   0x5   :  { %36 = dma.hbm_to_vmem [thread:$0]  %s29_s14, 2048, %s31_s16, [#allocation6], %s384_s20, %s384_s20, %s385_s21  }
   0x6   :  { %s386_s22 = smov [#allocation2]   ;;  %s41_s1 = sshll.u32 %s435_s2, 4  ;;  %s42_s1 = int_to_ptr.hbm [resolvable:$true] %s41_s1 }
   0x7   :  { %s17_s23 = sshll.u32 %s386_s22, 4  ;;  %s387_s0 = smov [#allocation7]   ;;  %s18_s23 = int_to_ptr.vmem [resolvable:$true] %s17_s23 }
   0x8   :  { %23 = dma.hbm_to_vmem [thread:$0]  %s16_s19, 2048, %s18_s23, [#allocation3], %s384_s20, %s384_s20, %s385_s21  }
   0x9   :  { %s43_s26 = sshll.u32 %s387_s0, 4  ;;  %s44_s26 = int_to_ptr.vmem [resolvable:$true] %s43_s26 }
   0xa   :  { %49 = dma.hbm_to_vmem [thread:$0]  %s42_s1, 2048, %s44_s26, [#allocation6], %s384_s20, %s384_s20, %s385_s21  }
   0xb   :  { %377 = dma.done.wait [#allocation3], 2048  }
   0xc   :  { %378 = vsyncadd [#allocation3], 4294965248 }
   0xd   :  { %379 = dma.done.wait [#allocation6], 4096  }
   0xe   :  { %380 = vsyncadd [#allocation6], 4294963200  ;;  %v125_v0 = vld [vmem:[#allocation7 + $0x78] sm:$0xff]  ;;  %v124_v1 = vld [vmem:[#allocation7 + $0x70] sm:$0xff]  ;;  %s388_s2 = smov [#allocation8]   ;;  %s213_s30 = sshll.u32 %s436_s3, 4  ;;  %s214_s30 = int_to_ptr.hbm [resolvable:$true] %s213_s30 }
   0xf   :  { %228 = vmatpush.msra.mxu2 %v125_v0  ;;  %229 = vmatpush.msra.mxu3 %v125_v0  ;;  %v123_v2 = vld [vmem:[#allocation7 + $0x68] sm:$0xff]  ;;  %v122_v3 = vld [vmem:[#allocation7 + $0x60] sm:$0xff]  ;;  %v121_v4 = vld [vmem:[#allocation7 + $0x58] sm:$0xff]  ;;  %s211_s27 = sshll.u32 %s388_s2, 4  ;;  %s212_s27 = int_to_ptr.vmem [resolvable:$true] %s211_s27 }
  0x10   :  { %126 = vmatpush.msra.mxu0 %v125_v0  ;;  %227 = vmatpush.msra.mxu1 %v125_v0  ;;  %v120_v5 = vld [vmem:[#allocation7 + $0x50] sm:$0xff]  ;;  %v119_v6 = vld [vmem:[#allocation7 + $0x48] sm:$0xff]  ;;  %v118_v7 = vld [vmem:[#allocation7 + $0x40] sm:$0xff] }
  0x11   :  { %231 = vmatpush.msra.mxu2 %v124_v1  ;;  %232 = vmatpush.msra.mxu3 %v124_v1  ;;  %v117_v8 = vld [vmem:[#allocation7 + $0x38] sm:$0xff]  ;;  %v116_v9 = vld [vmem:[#allocation7 + $0x30] sm:$0xff]  ;;  %v115_v10 = vld [vmem:[#allocation7 + $0x28] sm:$0xff] }
  0x12   :  { %127 = vmatpush.msra.mxu0 %v124_v1  ;;  %230 = vmatpush.msra.mxu1 %v124_v1  ;;  %v114_v11 = vld [vmem:[#allocation7 + $0x20] sm:$0xff]  ;;  %v113_v12 = vld [vmem:[#allocation7 + $0x18] sm:$0xff]  ;;  %v112_v13 = vld [vmem:[#allocation7 + $0x10] sm:$0xff] }
  0x13   :  { %234 = vmatpush.msra.mxu2 %v123_v2  ;;  %235 = vmatpush.msra.mxu3 %v123_v2  ;;  %v70_v14 = vld [vmem:[#allocation5 + $0x40] sm:$0xff]  ;;  %v111_v18 = vld [vmem:[#allocation7 + $0x8] sm:$0xff]  ;;  %v72_v40 = vld [vmem:[#allocation5 + $0x50] sm:$0xff] }
  0x14   :  { %128 = vmatpush.msra.mxu0 %v123_v2  ;;  %233 = vmatpush.msra.mxu1 %v123_v2  ;;  %v86_v15 = vld [vmem:[#allocation2 + $0x40] sm:$0xff]  ;;  %v71_v28 = vld [vmem:[#allocation5 + $0x48] sm:$0xff]  ;;  %v88_v41 = vld [vmem:[#allocation2 + $0x50] sm:$0xff] }
  0x15   :  { %237 = vmatpush.msra.mxu2 %v122_v3  ;;  %238 = vmatpush.msra.mxu3 %v122_v3  ;;  %v74_v16 = vld [vmem:[#allocation5 + $0x60] sm:$0xff]  ;;  %v102_v24 = vmul.f32 %v86_v15, %v70_v14  ;;  %v87_v29 = vld [vmem:[#allocation2 + $0x48] sm:$0xff]  ;;  %v76_v42 = vld [vmem:[#allocation5 + $0x70] sm:$0xff]  ;;  %v104_v48 = vmul.f32 %v88_v41, %v72_v40 }
  0x16   :  { %129 = vmatpush.msra.mxu0 %v122_v3  ;;  %236 = vmatpush.msra.mxu1 %v122_v3  ;;  %v90_v17 = vld [vmem:[#allocation2 + $0x60] sm:$0xff]  ;;  %v75_v30 = vld [vmem:[#allocation5 + $0x68] sm:$0xff]  ;;  %v103_v36 = vmul.f32 %v87_v29, %v71_v28  ;;  %v92_v43 = vld [vmem:[#allocation2 + $0x70] sm:$0xff] }
  0x17   :  { %240 = vmatpush.msra.mxu2 %v121_v4  ;;  %241 = vmatpush.msra.mxu3 %v121_v4  ;;  %v62_v19 = vld [vmem:[#allocation5] sm:$0xff]  ;;  %v106_v25 = vmul.f32 %v90_v17, %v74_v16  ;;  %v91_v31 = vld [vmem:[#allocation2 + $0x68] sm:$0xff]  ;;  %v64_v44 = vld [vmem:[#allocation5 + $0x10] sm:$0xff]  ;;  %v108_v49 = vmul.f32 %v92_v43, %v76_v42 }
  0x18   :  { %130 = vmatpush.msra.mxu0 %v121_v4  ;;  %239 = vmatpush.msra.mxu1 %v121_v4  ;;  %v78_v20 = vld [vmem:[#allocation2] sm:$0xff]  ;;  %v63_v32 = vld [vmem:[#allocation5 + $0x8] sm:$0xff]  ;;  %v107_v37 = vmul.f32 %v91_v31, %v75_v30  ;;  %v80_v45 = vld [vmem:[#allocation2 + $0x10] sm:$0xff] }
  0x19   :  { %243 = vmatpush.msra.mxu2 %v120_v5  ;;  %244 = vmatpush.msra.mxu3 %v120_v5  ;;  %v66_v21 = vld [vmem:[#allocation5 + $0x20] sm:$0xff]  ;;  %v94_v26 = vmul.f32 %v78_v20, %v62_v19  ;;  %v79_v33 = vld [vmem:[#allocation2 + $0x8] sm:$0xff]  ;;  %v68_v46 = vld [vmem:[#allocation5 + $0x30] sm:$0xff]  ;;  %v96_v50 = vmul.f32 %v80_v45, %v64_v44 }
  0x1a   :  { %131 = vmatpush.msra.mxu0 %v120_v5  ;;  %242 = vmatpush.msra.mxu1 %v120_v5  ;;  %v82_v22 = vld [vmem:[#allocation2 + $0x20] sm:$0xff]  ;;  %v67_v34 = vld [vmem:[#allocation5 + $0x28] sm:$0xff]  ;;  %v95_v38 = vmul.f32 %v79_v33, %v63_v32  ;;  %v84_v47 = vld [vmem:[#allocation2 + $0x30] sm:$0xff] }
  0x1b   :  { %246 = vmatpush.msra.mxu2 %v119_v6  ;;  %247 = vmatpush.msra.mxu3 %v119_v6  ;;  %v110_v23 = vld [vmem:[#allocation7] sm:$0xff]  ;;  %v98_v27 = vmul.f32 %v82_v22, %v66_v21  ;;  %v83_v35 = vld [vmem:[#allocation2 + $0x28] sm:$0xff]  ;;  %v100_v51 = vmul.f32 %v84_v47, %v68_v46  ;;  %v73_v52 = vld [vmem:[#allocation5 + $0x58] sm:$0xff] }
  0x1c   :  { %132 = vmatpush.msra.mxu0 %v119_v6  ;;  %245 = vmatpush.msra.mxu1 %v119_v6  ;;  %v99_v39 = vmul.f32 %v83_v35, %v67_v34  ;;  %v89_v53 = vld [vmem:[#allocation2 + $0x58] sm:$0xff] }
  0x1d   :  { %249 = vmatpush.msra.mxu2 %v118_v7  ;;  %250 = vmatpush.msra.mxu3 %v118_v7  ;;  %v77_v54 = vld [vmem:[#allocation5 + $0x78] sm:$0xff]  ;;  %v105_v60 = vmul.f32 %v89_v53, %v73_v52 }
  0x1e   :  { %133 = vmatpush.msra.mxu0 %v118_v7  ;;  %248 = vmatpush.msra.mxu1 %v118_v7  ;;  %v93_v55 = vld [vmem:[#allocation2 + $0x78] sm:$0xff] }
  0x1f   :  { %252 = vmatpush.msra.mxu2 %v117_v8  ;;  %253 = vmatpush.msra.mxu3 %v117_v8  ;;  %v65_v56 = vld [vmem:[#allocation5 + $0x18] sm:$0xff]  ;;  %v109_v61 = vmul.f32 %v93_v55, %v77_v54 }
  0x20   :  { %134 = vmatpush.msra.mxu0 %v117_v8  ;;  %251 = vmatpush.msra.mxu1 %v117_v8  ;;  %v81_v57 = vld [vmem:[#allocation2 + $0x18] sm:$0xff] }
  0x21   :  { %255 = vmatpush.msra.mxu2 %v116_v9  ;;  %256 = vmatpush.msra.mxu3 %v116_v9  ;;  %v69_v58 = vld [vmem:[#allocation5 + $0x38] sm:$0xff]  ;;  %v97_v62 = vmul.f32 %v81_v57, %v65_v56 }
  0x22   :  { %135 = vmatpush.msra.mxu0 %v116_v9  ;;  %254 = vmatpush.msra.mxu1 %v116_v9  ;;  %v85_v59 = vld [vmem:[#allocation2 + $0x38] sm:$0xff] }
  0x23   :  { %258 = vmatpush.msra.mxu2 %v115_v10  ;;  %259 = vmatpush.msra.mxu3 %v115_v10  ;;  %v101_v63 = vmul.f32 %v85_v59, %v69_v58 }
  0x24   :  { %136 = vmatpush.msra.mxu0 %v115_v10  ;;  %257 = vmatpush.msra.mxu1 %v115_v10 }
  0x25   :  { %261 = vmatpush.msra.mxu2 %v114_v11  ;;  %262 = vmatpush.msra.mxu3 %v114_v11 }
  0x26   :  { %137 = vmatpush.msra.mxu0 %v114_v11  ;;  %260 = vmatpush.msra.mxu1 %v114_v11 }
  0x27   :  { %264 = vmatpush.msra.mxu2 %v113_v12  ;;  %265 = vmatpush.msra.mxu3 %v113_v12 }
  0x28   :  { %138 = vmatpush.msra.mxu0 %v113_v12  ;;  %263 = vmatpush.msra.mxu1 %v113_v12 }
  0x29   :  { %267 = vmatpush.msra.mxu2 %v112_v13  ;;  %268 = vmatpush.msra.mxu3 %v112_v13 }
  0x2a   :  { %139 = vmatpush.msra.mxu0 %v112_v13  ;;  %266 = vmatpush.msra.mxu1 %v112_v13 }
  0x2b   :  { %270 = vmatpush.msra.mxu2 %v111_v18  ;;  %271 = vmatpush.msra.mxu3 %v111_v18 }
  0x2c   :  { %140 = vmatpush.msra.mxu0 %v111_v18  ;;  %269 = vmatpush.msra.mxu1 %v111_v18 }
  0x2d   :  { %273 = vmatpush.msra.mxu2 %v110_v23  ;;  %274 = vmatpush.msra.mxu3 %v110_v23 }
  0x2e   :  { %166 = vmatmul.f32.vlgmr.msra.gmra.mxu2 %v102_v24  ;;  %178 = vmatmul.f32.vlgmr.msra.gmra.mxu3 %v106_v25 }
  0x2f   :  { %141 = vmatpush.msra.mxu0 %v110_v23  ;;  %272 = vmatpush.msra.mxu1 %v110_v23 }
  0x30   :  { %142 = vmatmul.f32.vlgmr.msra.gmra.mxu0 %v94_v26  ;;  %154 = vmatmul.f32.vlgmr.msra.gmra.mxu1 %v98_v27 }
  0x36   :  { %169 = vmatmul.f32.gmra.mxu2 %v103_v36  ;;  %181 = vmatmul.f32.gmra.mxu3 %v107_v37 }
  0x38   :  { %145 = vmatmul.f32.gmra.mxu0 %v95_v38  ;;  %157 = vmatmul.f32.gmra.mxu1 %v99_v39 }
  0x3e   :  { %172 = vmatmul.f32.gmra.mxu2 %v104_v48  ;;  %184 = vmatmul.f32.gmra.mxu3 %v108_v49 }
  0x40   :  { %148 = vmatmul.f32.gmra.mxu0 %v96_v50  ;;  %160 = vmatmul.f32.gmra.mxu1 %v100_v51 }
  0x46   :  { %175 = vmatmul.f32.gmra.mxu2 %v105_v60  ;;  %187 = vmatmul.f32.gmra.mxu3 %v109_v61 }
  0x48   :  { %151 = vmatmul.f32.gmra.mxu0 %v97_v62  ;;  %163 = vmatmul.f32.gmra.mxu1 %v101_v63 }
  0xad   :  { %v143_v0 = vpop.f32.mrf.mxu0  ;;  %v155_v1 = vpop.f32.mrf.mxu1 }
  0xae   :  { %191 = vst [vmem:[#allocation8] sm:$0xff] %v143_v0 }
  0xaf   :  { %195 = vst [vmem:[#allocation8 + $0x20] sm:$0xff] %v155_v1 }
  0xb1   :  { %v167_v2 = vpop.f32.mrf.mxu2  ;;  %v179_v3 = vpop.f32.mrf.mxu3 }
  0xb2   :  { %199 = vst [vmem:[#allocation8 + $0x40] sm:$0xff] %v167_v2 }
  0xb3   :  { %203 = vst [vmem:[#allocation8 + $0x60] sm:$0xff] %v179_v3 }
  0xb5   :  { %v146_v4 = vpop.f32.mrf.mxu0  ;;  %v158_v5 = vpop.f32.mrf.mxu1 }
  0xb6   :  { %192 = vst [vmem:[#allocation8 + $0x8] sm:$0xff] %v146_v4 }
  0xb7   :  { %196 = vst [vmem:[#allocation8 + $0x28] sm:$0xff] %v158_v5 }
  0xb9   :  { %v170_v6 = vpop.f32.mrf.mxu2  ;;  %v182_v7 = vpop.f32.mrf.mxu3 }
  0xba   :  { %200 = vst [vmem:[#allocation8 + $0x48] sm:$0xff] %v170_v6 }
  0xbb   :  { %204 = vst [vmem:[#allocation8 + $0x68] sm:$0xff] %v182_v7 }
  0xbd   :  { %v149_v8 = vpop.f32.mrf.mxu0  ;;  %v161_v9 = vpop.f32.mrf.mxu1 }
  0xbe   :  { %193 = vst [vmem:[#allocation8 + $0x10] sm:$0xff] %v149_v8 }
  0xbf   :  { %197 = vst [vmem:[#allocation8 + $0x30] sm:$0xff] %v161_v9 }
  0xc1   :  { %v173_v10 = vpop.f32.mrf.mxu2  ;;  %v185_v11 = vpop.f32.mrf.mxu3 }
  0xc2   :  { %201 = vst [vmem:[#allocation8 + $0x50] sm:$0xff] %v173_v10 }
  0xc3   :  { %205 = vst [vmem:[#allocation8 + $0x70] sm:$0xff] %v185_v11 }
  0xc5   :  { %v152_v12 = vpop.f32.mrf.mxu0  ;;  %v164_v13 = vpop.f32.mrf.mxu1 }
  0xc6   :  { %194 = vst [vmem:[#allocation8 + $0x18] sm:$0xff] %v152_v12 }
  0xc7   :  { %198 = vst [vmem:[#allocation8 + $0x38] sm:$0xff] %v164_v13 }
  0xc9   :  { %v176_v14 = vpop.f32.mrf.mxu2  ;;  %v188_v15 = vpop.f32.mrf.mxu3 }
  0xca   :  { %202 = vst [vmem:[#allocation8 + $0x58] sm:$0xff] %v176_v14 }
  0xcb   :  { %206 = vst [vmem:[#allocation8 + $0x78] sm:$0xff] %v188_v15 }
  0xcc   :  { %219 = dma.vmem_to_hbm [thread:$0]  %s212_s27, 2048, %s214_s30, [#allocation4], %s384_s20, %s384_s20, %s385_s21  }
  0xcd   :  { %381 = dma.done.wait [#allocation4], 2048  }
  0xce   :  { %382 = vsyncadd [#allocation4], 4294965248 }
  0xcf   :  { %224 = vsyncpa [#allocation3], 1 }
  0xd0   :  { %225 = vsyncpa [#allocation6], 1 }
  0xd1   :  { %226 = vsyncpa [#allocation4], 1 }

</bundles_post_ra>
